<compile_context>
chip_gen: v5e
topology: v5e:2x2
jax: 0.10.0
libtpu: 0.0.40
codegen_flags: <defaults>
</compile_context>

<pallas_src>
import functools

import jax
import jax.numpy as jnp
from jax.experimental import pallas as pl
from jax.experimental.pallas import tpu as pltpu

EPS = 1e-5


def _round_up(x, m):
    return ((x + m - 1) // m) * m


def _floor_128(v):
    return max(128, (v // 128) * 128)


def _device_budget():
    """Generation-aware (physical VMEM, tile budget, TensorCores per chip)."""
    phys, cores = 128 << 20, 1
    try:
        kind = jax.devices()[0].device_kind.lower()
    except Exception:
        kind = ""
    if "v7" in kind:                      # v7x: 64 MiB VMEM per TC, 2 TCs
        phys, cores = 64 << 20, 2
    budget = phys - (24 << 20) if phys >= (128 << 20) else phys - (16 << 20)
    return phys, budget, cores


def _est_bytes(N, IN_p, tk, tn, in_bytes, x_resident):
    """VMEM footprint; every BlockSpec buffer is double-buffered by the pipeline."""
    x_b = N * (IN_p if x_resident else tk) * in_bytes
    w_b = tk * tn * in_bytes
    gb_b = 2 * tn * 4
    out_b = N * tn * 4
    return 2 * (x_b + w_b + gb_b + out_b)


def _pick_tiles(N, IN, OUT, in_bytes, budget, cores):
    IN_128 = _round_up(IN, 128)
    OUT_128 = _round_up(OUT, 128)

    def shrink(x_resident):
        tn = min(512, OUT_128)
        tk = min(512, IN_128)
        # Guarantee >= `cores` feature tiles so the "parallel" axis can shard
        # across v7x's 2 TensorCores (no-op on v5e/v6e).
        if cores >= 2 and OUT_128 >= cores * 128:
            tn = min(tn, _floor_128(OUT_128 // cores))
        while True:
            IN_p = _round_up(IN, tk)
            if _est_bytes(N, IN_p, tk, tn, in_bytes, x_resident) <= budget:
                return tk, tn, True
            if tk > 128:
                tk = _floor_128(tk // 2)
            elif tn > 128:
                tn = _floor_128(tn // 2)
            else:
                return tk, tn, False

    tk, tn, ok = shrink(True)
    if ok:
        return tk, tn, True
    tk, tn, ok = shrink(False)
    if ok:
        return tk, tn, False
    raise ValueError("batch too large for single-pass fused BN kernel "
                     f"(N={N}, IN={IN}, OUT={OUT}); need a chunked-N BN path")


def _mlp_kernel(x_ref, wt_ref, gamma_ref, beta_ref, o_ref, *, tk, x_resident):
    """One (feature-tile j, K-tile k) step of Linear -> BatchNorm1d -> ReLU.

    x_ref:     (N, IN_p) resident x  OR  (N, tk) streamed x tile (f32/bf16)
    wt_ref:    (tk, tn)  transposed-weight tile (f32/bf16)
    gamma_ref: (1, tn)   f32 BN scale
    beta_ref:  (1, tn)   f32 BN shift
    o_ref:     (N, tn)   f32 output tile; VMEM-resident across k, used as the
                         matmul accumulator and rewritten in place at k==last.
    """
    k = pl.program_id(1)

    @pl.when(k == 0)
    def _():
        o_ref[...] = jnp.zeros_like(o_ref)

    if x_resident:
        off = pl.multiple_of(k * tk, tk)
        x_blk = x_ref[:, pl.ds(off, tk)]
    else:
        x_blk = x_ref[...]

    o_ref[...] += jnp.dot(x_blk, wt_ref[...], preferred_element_type=jnp.float32)

    @pl.when(k == pl.num_programs(1) - 1)
    def _():
        z = o_ref[...]                               # (N, tn) f32, full batch
        inv_n = 1.0 / z.shape[0]                     # true (unpadded) batch size
        # Two-pass (mean, centered variance) directly on the in-VMEM block:
        # no extra HBM traffic, no E[x^2]-E[x]^2 cancellation.
        mean = jnp.sum(z, axis=0, keepdims=True) * inv_n
        centered = z - mean
        var = jnp.sum(centered * centered, axis=0, keepdims=True) * inv_n
        inv_std = jax.lax.rsqrt(var + EPS)           # EUP slot -> ~free
        y = centered * (inv_std * gamma_ref[...]) + beta_ref[...]
        o_ref[...] = jnp.maximum(y, 0.0)


def prepare_params(weight, gamma, beta, *, batch_size, mxu_dtype=jnp.bfloat16):
    """One-time, out-of-hot-path layout prep for MLPLayer parameters.

    weight: (OUT, IN) nn.Linear weight (bias=False); gamma/beta: (OUT,) BN affine.
    The transposed / zero-padded / dtype-cast weight and padded gamma/beta are
    stored in their final layout so the per-call path never rewrites them.
    """
    OUT, IN = weight.shape
    in_dtype = jnp.dtype(mxu_dtype)
    phys, budget, cores = _device_budget()

    tk, tn, x_resident = _pick_tiles(batch_size, IN, OUT, in_dtype.itemsize,
                                     budget, cores)
    IN_p = _round_up(IN, tk)
    OUT_p = _round_up(OUT, tn)

    wt = jnp.asarray(weight).T                                  # (IN, OUT)
    wt_p = jnp.pad(wt, ((0, IN_p - IN), (0, OUT_p - OUT))).astype(in_dtype)
    gamma_p = jnp.pad(jnp.asarray(gamma, jnp.float32),
                      (0, OUT_p - OUT)).reshape(1, OUT_p)
    beta_p = jnp.pad(jnp.asarray(beta, jnp.float32),
                     (0, OUT_p - OUT)).reshape(1, OUT_p)

    est = _est_bytes(batch_size, IN_p, tk, tn, in_dtype.itemsize, x_resident)
    vmem_limit = int(min(phys - (8 << 20), max(32 << 20, est + (4 << 20))))

    return dict(wt=wt_p, gamma=gamma_p, beta=beta_p, tk=tk, tn=tn,
                IN=IN, OUT=OUT, IN_p=IN_p, OUT_p=OUT_p, N=batch_size,
                dtype=in_dtype, x_resident=x_resident, vmem_limit=vmem_limit)


def mlp_layer(x, params):
    """Fused Linear -> BatchNorm1d(batch stats) -> ReLU forward pass."""
    N, IN = x.shape
    assert IN == params["IN"] and N == params["N"], "params prepared for other shapes"
    tk, tn = params["tk"], params["tn"]
    IN_p, OUT_p = params["IN_p"], params["OUT_p"]
    in_dtype = params["dtype"]
    x_resident = params["x_resident"]

    # Pad (only if needed) in the source dtype, then a single cast — avoids an
    # extra full-precision HBM round trip on the activation.
    x_p = x if IN_p == IN else jnp.pad(x, ((0, 0), (0, IN_p - IN)))
    if x_p.dtype != in_dtype:
        x_p = x_p.astype(in_dtype)

    grid = (OUT_p // tn, IN_p // tk)
    if x_resident:
        # Constant block index => DMA'd once, stays resident across all (j, k).
        x_spec = pl.BlockSpec((N, IN_p), lambda j, k: (0, 0))
    else:
        x_spec = pl.BlockSpec((N, tk), lambda j, k: (0, k))

    kernel = functools.partial(_mlp_kernel, tk=tk, x_resident=x_resident)

    out_p = pl.pallas_call(
        kernel,
        out_shape=jax.ShapeDtypeStruct((N, OUT_p), jnp.float32),
        grid_spec=pltpu.PrefetchScalarGridSpec(
            num_scalar_prefetch=0,
            grid=grid,
            in_specs=[
                x_spec,                                         # x
                pl.BlockSpec((tk, tn), lambda j, k: (k, j)),    # Wt
                pl.BlockSpec((1, tn), lambda j, k: (0, j)),     # gamma
                pl.BlockSpec((1, tn), lambda j, k: (0, j)),     # beta
            ],
            out_specs=pl.BlockSpec((N, tn), lambda j, k: (0, j)),
        ),
        compiler_params=pltpu.CompilerParams(
            dimension_semantics=("parallel", "arbitrary"),
            vmem_limit_bytes=params["vmem_limit"],
        ),
    )(x_p, params["wt"], params["gamma"], params["beta"])

    return out_p[:, :params["OUT"]]


if __name__ == "__main__":
    # Small shapes, deliberately not 128-multiples, so padding + a real grid
    # are both exercised.
    N, IN, OUT = 64, 192, 320

    key = jax.random.PRNGKey(0)
    kx, kw, kg, kb = jax.random.split(key, 4)

    x = jax.random.normal(kx, (N, IN), dtype=jnp.float32)
    bound = 1.0 / (IN ** 0.5)
    weight = jax.random.uniform(kw, (OUT, IN), dtype=jnp.float32,
                                minval=-bound, maxval=bound)
    gamma = jax.random.uniform(kg, (OUT,), dtype=jnp.float32, minval=0.5, maxval=1.5)
    beta = 0.1 * jax.random.normal(kb, (OUT,), dtype=jnp.float32)

    # Reference: training-mode BatchNorm1d (batch stats, biased variance).
    z = x @ weight.T
    mean = z.mean(axis=0, keepdims=True)
    var = ((z - mean) ** 2).mean(axis=0, keepdims=True)
    ref = jnp.maximum((z - mean) / jnp.sqrt(var + EPS) * gamma + beta, 0.0)

    # f32-operand MXU path (opt-in): tight tolerance.
    params_f32 = prepare_params(weight, gamma, beta, batch_size=N,
                                mxu_dtype=jnp.float32)
    out_f32 = mlp_layer(x, params_f32)
    jax.block_until_ready(out_f32)
    assert out_f32.shape == ref.shape
    assert jnp.allclose(out_f32, ref, atol=1e-3, rtol=1e-3), "f32 mismatch vs reference"

    # bf16-operand MXU path (default; halves x/Wt DMA, full-rate MXU on
    # v5e/v6e/v7x); BN statistics / affine / ReLU stay float32.
    params_bf16 = prepare_params(weight, gamma, beta, batch_size=N)
    out_bf16 = mlp_layer(x, params_bf16)
    jax.block_until_ready(out_bf16)
    assert float(jnp.max(jnp.abs(out_bf16 - ref))) < 0.1, "bf16 mismatch vs reference"

    print("KERNEL_OK")
</pallas_src>

<mosaic_0001>
module attributes {stable_mosaic.version = 11 : i64} {
  func.func @_mlp_kernel(%arg0: i32, %arg1: i32, %arg2: memref<64x256xf32, #tpu.memory_space<vmem>>, %arg3: memref<256x384xf32, #tpu.memory_space<vmem>>, %arg4: memref<1x384xf32, #tpu.memory_space<vmem>>, %arg5: memref<1x384xf32, #tpu.memory_space<vmem>>, %arg6: memref<64x384xf32, #tpu.memory_space<vmem>>) attributes {dimension_semantics = [#tpu.dimension_semantics<parallel>, #tpu.dimension_semantics<arbitrary>], iteration_bounds = array<i64: 1, 1>, scalar_prefetch = 0 : i64, scratch_operands = 0 : i64, tpu.core_type = #tpu.core_type<tc>, window_params = [{pipeline_mode = #tpu.pipeline_mode<synchronous>, transform_indices = @transform_0, window_bounds = array<i64: 64, 256>}, {transform_indices = @transform_1, window_bounds = array<i64: 256, 384>}, {transform_indices = @transform_2, window_bounds = array<i64: 1, 384>}, {transform_indices = @transform_3, window_bounds = array<i64: 1, 384>}, {transform_indices = @transform_4, window_bounds = array<i64: 64, 384>}]} {
    %c0_i32 = arith.constant 0 : i32
    %0 = arith.cmpi eq, %arg1, %c0_i32 : i32
    %1 = arith.extui %0 : i1 to i32
    %c0_i32_0 = arith.constant 0 : i32
    %2 = arith.cmpi ne, %1, %c0_i32_0 : i32
    scf.if %2 {
      %cst_9 = arith.constant 0.000000e+00 : f32
      %15 = vector.broadcast %cst_9 : f32 to vector<64x384xf32>
      %c0_10 = arith.constant 0 : index
      %c0_11 = arith.constant 0 : index
      %16 = vector.load %arg6[%c0_10, %c0_11] : memref<64x384xf32, #tpu.memory_space<vmem>>, vector<64x384xf32>
      tpu.vector_store %arg6[%c0_10, %c0_11], %15 {strides = array<i32>} : memref<64x384xf32, #tpu.memory_space<vmem>>, vector<64x384xf32>,
    } else {
    }
    %c256_i32 = arith.constant 256 : i32
    %3 = arith.muli %arg1, %c256_i32 : i32
    %4 = tpu.assume_multiple %3, 256 : i32
    %c0 = arith.constant 0 : index
    %5 = arith.index_cast %4 : i32 to index
    %6 = vector.load %arg2[%c0, %5] : memref<64x256xf32, #tpu.memory_space<vmem>>, vector<64x256xf32>
    %c0_1 = arith.constant 0 : index
    %c0_2 = arith.constant 0 : index
    %7 = vector.load %arg6[%c0_1, %c0_2] : memref<64x384xf32, #tpu.memory_space<vmem>>, vector<64x384xf32>
    %c0_3 = arith.constant 0 : index
    %c0_4 = arith.constant 0 : index
    %8 = vector.load %arg3[%c0_3, %c0_4] : memref<256x384xf32, #tpu.memory_space<vmem>>, vector<256x384xf32>
    %cst = arith.constant dense<0.000000e+00> : vector<64x384xf32>
    %9 = tpu.matmul %6, %8, %cst {dimension_numbers = #tpu.dot_dimension_numbers<[1], [0], [0], [1], [0, 0, 1, 1], [], []>} : vector<64x256xf32>, vector<256x384xf32>, vector<64x384xf32> -> vector<64x384xf32>
    %10 = arith.addf %7, %9 : vector<64x384xf32>
    %c0_5 = arith.constant 0 : index
    %c0_6 = arith.constant 0 : index
    %11 = vector.load %arg6[%c0_5, %c0_6] : memref<64x384xf32, #tpu.memory_space<vmem>>, vector<64x384xf32>
    tpu.vector_store %arg6[%c0_5, %c0_6], %10 {strides = array<i32>} : memref<64x384xf32, #tpu.memory_space<vmem>>, vector<64x384xf32>,
    %c0_i32_7 = arith.constant 0 : i32
    %12 = arith.cmpi eq, %arg1, %c0_i32_7 : i32
    %13 = arith.extui %12 : i1 to i32
    %c0_i32_8 = arith.constant 0 : i32
    %14 = arith.cmpi ne, %13, %c0_i32_8 : i32
    scf.if %14 {
      %c0_9 = arith.constant 0 : index
      %c0_10 = arith.constant 0 : index
      %15 = vector.load %arg6[%c0_9, %c0_10] : memref<64x384xf32, #tpu.memory_space<vmem>>, vector<64x384xf32>
      %cst_11 = arith.constant dense<0.000000e+00> : vector<384xf32>
      %16 = vector.multi_reduction <add>, %15, %cst_11 [0] : vector<64x384xf32> to vector<384xf32>
      %17 = vector.shape_cast %16 : vector<384xf32> to vector<1x384xf32>
      %cst_12 = arith.constant 1.562500e-02 : f32
      %18 = vector.broadcast %cst_12 : f32 to vector<1x384xf32>
      %19 = arith.mulf %17, %18 : vector<1x384xf32>
      %20 = vector.broadcast %19 : vector<1x384xf32> to vector<64x384xf32>
      %21 = arith.subf %15, %20 : vector<64x384xf32>
      %22 = arith.mulf %21, %21 : vector<64x384xf32>
      %cst_13 = arith.constant dense<0.000000e+00> : vector<384xf32>
      %23 = vector.multi_reduction <add>, %22, %cst_13 [0] : vector<64x384xf32> to vector<384xf32>
      %24 = vector.shape_cast %23 : vector<384xf32> to vector<1x384xf32>
      %cst_14 = arith.constant 1.562500e-02 : f32
      %25 = vector.broadcast %cst_14 : f32 to vector<1x384xf32>
      %26 = arith.mulf %24, %25 : vector<1x384xf32>
      %cst_15 = arith.constant 9.99999974E-6 : f32
      %27 = vector.broadcast %cst_15 : f32 to vector<1x384xf32>
      %28 = arith.addf %26, %27 : vector<1x384xf32>
      %29 = math.rsqrt %28 : vector<1x384xf32>
      %c0_16 = arith.constant 0 : index
      %c0_17 = arith.constant 0 : index
      %30 = vector.load %arg4[%c0_16, %c0_17] : memref<1x384xf32, #tpu.memory_space<vmem>>, vector<1x384xf32>
      %31 = arith.mulf %29, %30 : vector<1x384xf32>
      %32 = vector.broadcast %31 : vector<1x384xf32> to vector<64x384xf32>
      %33 = arith.mulf %21, %32 : vector<64x384xf32>
      %c0_18 = arith.constant 0 : index
      %c0_19 = arith.constant 0 : index
      %34 = vector.load %arg5[%c0_18, %c0_19] : memref<1x384xf32, #tpu.memory_space<vmem>>, vector<1x384xf32>
      %35 = vector.broadcast %34 : vector<1x384xf32> to vector<64x384xf32>
      %36 = arith.addf %33, %35 : vector<64x384xf32>
      %cst_20 = arith.constant 0.000000e+00 : f32
      %37 = vector.broadcast %cst_20 : f32 to vector<64x384xf32>
      %38 = arith.maximumf %36, %37 : vector<64x384xf32>
      %c0_21 = arith.constant 0 : index
      %c0_22 = arith.constant 0 : index
      %39 = vector.load %arg6[%c0_21, %c0_22] : memref<64x384xf32, #tpu.memory_space<vmem>>, vector<64x384xf32>
      tpu.vector_store %arg6[%c0_21, %c0_22], %38 {strides = array<i32>} : memref<64x384xf32, #tpu.memory_space<vmem>>, vector<64x384xf32>,
    } else {
    }
    return
  }
  func.func @transform_0(%arg0: i32, %arg1: i32) -> (i32, i32) {
    %c0_i32 = arith.constant 0 : i32
    %c0_i32_0 = arith.constant 0 : i32
    %c0_i32_1 = arith.constant 0 : i32
    return %c0_i32, %c0_i32_0 : i32, i32
  }
  func.func @transform_1(%arg0: i32, %arg1: i32) -> (i32, i32) {
    %c0_i32 = arith.constant 0 : i32
    return %arg1, %arg0 : i32, i32
  }
  func.func @transform_2(%arg0: i32, %arg1: i32) -> (i32, i32) {
    %c0_i32 = arith.constant 0 : i32
    %c0_i32_0 = arith.constant 0 : i32
    return %c0_i32, %arg0 : i32, i32
  }
  func.func @transform_3(%arg0: i32, %arg1: i32) -> (i32, i32) {
    %c0_i32 = arith.constant 0 : i32
    %c0_i32_0 = arith.constant 0 : i32
    return %c0_i32, %arg0 : i32, i32
  }
  func.func @transform_4(%arg0: i32, %arg1: i32) -> (i32, i32) {
    %c0_i32 = arith.constant 0 : i32
    %c0_i32_0 = arith.constant 0 : i32
    return %c0_i32, %arg0 : i32, i32
  }
}

</mosaic_0001>

<bundles_post_ra>
// kernel: tpu_custom_call.1
= control target key start
LH: loop header
LB: loop body
LE: loop exit
PB: predicated region body
PF: predicated region fallthrough
CT: control target
= control target key end

     0   :  { %9 = vsyncpa [#allocation3], 0  ;;  %s1371_s0 = inlined_call_operand.hbm [shape: f32[64,256], index: 0, kind: input, shape index: {}]   ;;  %s1372_s1 = inlined_call_operand.hbm [shape: f32[256,384], index: 1, kind: input, shape index: {}]   ;;  %s1373_s2 = inlined_call_operand.hbm [shape: f32[1,384], index: 2, kind: input, shape index: {}]   ;;  %s1374_s3 = inlined_call_operand.hbm [shape: f32[1,384], index: 3, kind: input, shape index: {}]   ;;  %s1375_s4 = inlined_call_operand.hbm [shape: f32[64,384], index: 4, kind: output, shape index: {}]  }
   0x1   :  { %10 = vsyncpa [#allocation6], 0 }
   0x2   :  { %11 = vsyncpa [#allocation9], 0  ;;  %s30_s17 = sshll.u32 %s1372_s1, 4  ;;  %s31_s17 = int_to_ptr.hbm [resolvable:$true] %s30_s17 }
   0x3   :  { %12 = vsyncpa [#allocation4], 0  ;;  %s1049_s18 = smov [#allocation5]   ;;  %s17_s22 = sshll.u32 %s1371_s0, 4  ;;  %s18_s22 = int_to_ptr.hbm [resolvable:$true] %s17_s22 }
   0x4   :  { %s32_s19 = sshll.u32 %s1049_s18, 4  ;;  %s1050_s23 = smov 384   ;;  %s33_s19 = int_to_ptr.vmem [resolvable:$true] %s32_s19 }
   0x5   :  { %s1051_s24 = smov 24   ;;  %s1052_s25 = smov [#allocation2]  }
   0x6   :  { %38 = dma.hbm_to_vmem [thread:$0]  %s31_s17, 12288, %s33_s19, [#allocation6], %s1050_s23, %s1050_s23, %s1051_s24  }
   0x7   :  { %s19_s26 = sshll.u32 %s1052_s25, 4  ;;  %s1053_s1 = smov 256   ;;  %s20_s26 = int_to_ptr.vmem [resolvable:$true] %s19_s26 }
   0x8   :  { %s1054_s27 = smov 16   ;;  %s44_s30 = sshll.u32 %s1373_s2, 4  ;;  %s45_s30 = int_to_ptr.hbm [resolvable:$true] %s44_s30 }
   0x9   :  { %25 = dma.hbm_to_vmem [thread:$0]  %s18_s22, 2048, %s20_s26, [#allocation3], %s1053_s1, %s1053_s1, %s1054_s27  }
   0xa   :  { %s1055_s5 = smov [#allocation7]   ;;  %s55_s8 = sshll.u32 %s1374_s3, 4  ;;  %s56_s8 = int_to_ptr.hbm [resolvable:$true] %s55_s8 }
   0xb   :  { %s46_s0 = sshll.u32 %s1055_s5, 4  ;;  %s1056_s9 = smov [#allocation8]   ;;  %s47_s0 = int_to_ptr.vmem [resolvable:$true] %s46_s0 }
   0xc   :  { %49 = dma.hbm_to_vmem [thread:$0]  %s45_s30, 48, %s47_s0, [#allocation6]  }
   0xd   :  { %s57_s10 = sshll.u32 %s1056_s9, 4  ;;  %s58_s10 = int_to_ptr.vmem [resolvable:$true] %s57_s10 }
   0xe   :  { %60 = dma.hbm_to_vmem [thread:$0]  %s56_s8, 48, %s58_s10, [#allocation9]  }
   0xf   :  { %1041 = dma.done.wait [#allocation3], 2048  }
  0x10   :  { %1042 = vsyncadd [#allocation3], 4294965248 }
  0x11   :  { %1043 = dma.done.wait [#allocation6], 12336  }
  0x12   :  { %1044 = vsyncadd [#allocation6], 4294954960 }
  0x13   :  { %1045 = dma.done.wait [#allocation9], 48  }
  0x14   :  { %1046 = vsyncadd [#allocation9], 4294967248  ;;  %v195_v0 = vld [vmem:[#allocation5 + $0x168] sm:$0xff]  ;;  %v192_v2 = vld [vmem:[#allocation5 + $0x150] sm:$0xff]  ;;  %s1057_s2 = smov [#allocation10]   ;;  %s856_s13 = sshll.u32 %s1375_s4, 4  ;;  %s857_s13 = int_to_ptr.hbm [resolvable:$true] %s856_s13 }
  0x15   :  { %v243_v1 = vld [vmem:[#allocation5 + $0x2e8] sm:$0xff]  ;;  %246 = vmatpush.msra.mxu0 %v195_v0  ;;  %873 = vmatpush.msra.mxu2 %v195_v0  ;;  %v240_v3 = vld [vmem:[#allocation5 + $0x2d0] sm:$0xff]  ;;  %v189_v4 = vld [vmem:[#allocation5 + $0x138] sm:$0xff]  ;;  %s854_s3 = sshll.u32 %s1057_s2, 4  ;;  %s855_s3 = int_to_ptr.vmem [resolvable:$true] %s854_s3 }
  0x16   :  { %287 = vmatpush.msra.mxu1 %v243_v1  ;;  %889 = vmatpush.msra.mxu3 %v243_v1  ;;  %v237_v5 = vld [vmem:[#allocation5 + $0x2b8] sm:$0xff]  ;;  %v186_v6 = vld [vmem:[#allocation5 + $0x120] sm:$0xff]  ;;  %v183_v8 = vld [vmem:[#allocation5 + $0x108] sm:$0xff] }
  0x17   :  { %247 = vmatpush.msra.mxu0 %v192_v2  ;;  %874 = vmatpush.msra.mxu2 %v192_v2  ;;  %v234_v7 = vld [vmem:[#allocation5 + $0x2a0] sm:$0xff]  ;;  %v231_v9 = vld [vmem:[#allocation5 + $0x288] sm:$0xff]  ;;  %v180_v10 = vld [vmem:[#allocation5 + $0xf0] sm:$0xff] }
  0x18   :  { %288 = vmatpush.msra.mxu1 %v240_v3  ;;  %890 = vmatpush.msra.mxu3 %v240_v3  ;;  %v228_v11 = vld [vmem:[#allocation5 + $0x270] sm:$0xff]  ;;  %v177_v12 = vld [vmem:[#allocation5 + $0xd8] sm:$0xff]  ;;  %v174_v14 = vld [vmem:[#allocation5 + $0xc0] sm:$0xff] }
  0x19   :  { %248 = vmatpush.msra.mxu0 %v189_v4  ;;  %875 = vmatpush.msra.mxu2 %v189_v4  ;;  %v225_v13 = vld [vmem:[#allocation5 + $0x258] sm:$0xff]  ;;  %v222_v15 = vld [vmem:[#allocation5 + $0x240] sm:$0xff]  ;;  %v171_v16 = vld [vmem:[#allocation5 + $0xa8] sm:$0xff] }
  0x1a   :  { %289 = vmatpush.msra.mxu1 %v237_v5  ;;  %891 = vmatpush.msra.mxu3 %v237_v5  ;;  %v219_v17 = vld [vmem:[#allocation5 + $0x228] sm:$0xff]  ;;  %v168_v18 = vld [vmem:[#allocation5 + $0x90] sm:$0xff]  ;;  %v165_v20 = vld [vmem:[#allocation5 + $0x78] sm:$0xff] }
  0x1b   :  { %249 = vmatpush.msra.mxu0 %v186_v6  ;;  %876 = vmatpush.msra.mxu2 %v186_v6  ;;  %v216_v19 = vld [vmem:[#allocation5 + $0x210] sm:$0xff]  ;;  %v213_v21 = vld [vmem:[#allocation5 + $0x1f8] sm:$0xff]  ;;  %v162_v22 = vld [vmem:[#allocation5 + $0x60] sm:$0xff] }
  0x1c   :  { %290 = vmatpush.msra.mxu1 %v234_v7  ;;  %892 = vmatpush.msra.mxu3 %v234_v7  ;;  %v210_v23 = vld [vmem:[#allocation5 + $0x1e0] sm:$0xff]  ;;  %v159_v24 = vld [vmem:[#allocation5 + $0x48] sm:$0xff]  ;;  %v156_v26 = vld [vmem:[#allocation5 + $0x30] sm:$0xff] }
  0x1d   :  { %250 = vmatpush.msra.mxu0 %v183_v8  ;;  %877 = vmatpush.msra.mxu2 %v183_v8  ;;  %v207_v25 = vld [vmem:[#allocation5 + $0x1c8] sm:$0xff]  ;;  %v204_v27 = vld [vmem:[#allocation5 + $0x1b0] sm:$0xff]  ;;  %v153_v28 = vld [vmem:[#allocation5 + $0x18] sm:$0xff] }
  0x1e   :  { %291 = vmatpush.msra.mxu1 %v231_v9  ;;  %893 = vmatpush.msra.mxu3 %v231_v9  ;;  %v201_v29 = vld [vmem:[#allocation5 + $0x198] sm:$0xff]  ;;  %v150_v30 = vld [vmem:[#allocation5] sm:$0xff]  ;;  %v1102_v34 = vld [vmem:[#allocation2 + $0x8] sm:$0xff] }
  0x1f   :  { %251 = vmatpush.msra.mxu0 %v180_v10  ;;  %878 = vmatpush.msra.mxu2 %v180_v10  ;;  %v198_v31 = vld [vmem:[#allocation5 + $0x180] sm:$0xff]  ;;  %v1104_v35 = vld [vmem:[#allocation2 + $0x48] sm:$0xff]  ;;  %v196_v36 = vld [vmem:[#allocation5 + $0x170] sm:$0xff] }
  0x20   :  { %292 = vmatpush.msra.mxu1 %v228_v11  ;;  %894 = vmatpush.msra.mxu3 %v228_v11  ;;  %v1098_v32 = vld [vmem:[#allocation2] sm:$0xff]  ;;  %v244_v37 = vld [vmem:[#allocation5 + $0x2f0] sm:$0xff]  ;;  %v197_v38 = vld [vmem:[#allocation5 + $0x178] sm:$0xff] }
  0x21   :  { %252 = vmatpush.msra.mxu0 %v177_v12  ;;  %879 = vmatpush.msra.mxu2 %v177_v12  ;;  %v1100_v33 = vld [vmem:[#allocation2 + $0x40] sm:$0xff]  ;;  %v245_v39 = vld [vmem:[#allocation5 + $0x2f8] sm:$0xff]  ;;  %v191_v46 = vld [vmem:[#allocation5 + $0x148] sm:$0xff] }
  0x22   :  { %293 = vmatpush.msra.mxu1 %v225_v13  ;;  %895 = vmatpush.msra.mxu3 %v225_v13  ;;  %v193_v40 = vld [vmem:[#allocation5 + $0x158] sm:$0xff]  ;;  %v194_v42 = vld [vmem:[#allocation5 + $0x160] sm:$0xff]  ;;  %v239_v47 = vld [vmem:[#allocation5 + $0x2c8] sm:$0xff] }
  0x23   :  { %253 = vmatpush.msra.mxu0 %v174_v14  ;;  %880 = vmatpush.msra.mxu2 %v174_v14  ;;  %v241_v41 = vld [vmem:[#allocation5 + $0x2d8] sm:$0xff]  ;;  %v242_v43 = vld [vmem:[#allocation5 + $0x2e0] sm:$0xff]  ;;  %v187_v48 = vld [vmem:[#allocation5 + $0x128] sm:$0xff] }
  0x24   :  { %294 = vmatpush.msra.mxu1 %v222_v15  ;;  %896 = vmatpush.msra.mxu3 %v222_v15  ;;  %v190_v44 = vld [vmem:[#allocation5 + $0x140] sm:$0xff]  ;;  %v235_v49 = vld [vmem:[#allocation5 + $0x2a8] sm:$0xff]  ;;  %v188_v50 = vld [vmem:[#allocation5 + $0x130] sm:$0xff] }
  0x25   :  { %254 = vmatpush.msra.mxu0 %v171_v16  ;;  %881 = vmatpush.msra.mxu2 %v171_v16  ;;  %v238_v45 = vld [vmem:[#allocation5 + $0x2c0] sm:$0xff]  ;;  %v236_v51 = vld [vmem:[#allocation5 + $0x2b0] sm:$0xff]  ;;  %v1114_v54 = vld [vmem:[#allocation2 + $0x18] sm:$0xff] }
  0x26   :  { %295 = vmatpush.msra.mxu1 %v219_v17  ;;  %897 = vmatpush.msra.mxu3 %v219_v17  ;;  %v1110_v52 = vld [vmem:[#allocation2 + $0x10] sm:$0xff]  ;;  %v1116_v55 = vld [vmem:[#allocation2 + $0x58] sm:$0xff]  ;;  %v182_v62 = vld [vmem:[#allocation5 + $0x100] sm:$0xff] }
  0x27   :  { %255 = vmatpush.msra.mxu0 %v168_v18  ;;  %882 = vmatpush.msra.mxu2 %v168_v18  ;;  %v1112_v53 = vld [vmem:[#allocation2 + $0x50] sm:$0xff]  ;;  %v185_v58 = vld [vmem:[#allocation5 + $0x118] sm:$0xff]  ;;  %v230_v63 = vld [vmem:[#allocation5 + $0x280] sm:$0xff] }
  0x28   :  { %296 = vmatpush.msra.mxu1 %v216_v19  ;;  %898 = vmatpush.msra.mxu3 %v216_v19  ;;  %v184_v56 = vld [vmem:[#allocation5 + $0x110] sm:$0xff]  ;;  %v233_v59 = vld [vmem:[#allocation5 + $0x298] sm:$0xff]  ;;  %v178_v0 = vld [vmem:[#allocation5 + $0xe0] sm:$0xff] }
  0x29   :  { %256 = vmatpush.msra.mxu0 %v165_v20  ;;  %883 = vmatpush.msra.mxu2 %v165_v20  ;;  %v232_v57 = vld [vmem:[#allocation5 + $0x290] sm:$0xff]  ;;  %v181_v60 = vld [vmem:[#allocation5 + $0xf8] sm:$0xff]  ;;  %v226_v1 = vld [vmem:[#allocation5 + $0x260] sm:$0xff] }
  0x2a   :  { %297 = vmatpush.msra.mxu1 %v213_v21  ;;  %899 = vmatpush.msra.mxu3 %v213_v21  ;;  %v229_v61 = vld [vmem:[#allocation5 + $0x278] sm:$0xff]  ;;  %v179_v2 = vld [vmem:[#allocation5 + $0xe8] sm:$0xff]  ;;  %v176_v6 = vld [vmem:[#allocation5 + $0xd0] sm:$0xff] }
  0x2b   :  { %257 = vmatpush.msra.mxu0 %v162_v22  ;;  %884 = vmatpush.msra.mxu2 %v162_v22  ;;  %v227_v3 = vld [vmem:[#allocation5 + $0x268] sm:$0xff]  ;;  %v224_v7 = vld [vmem:[#allocation5 + $0x250] sm:$0xff]  ;;  %v1122_v8 = vld [vmem:[#allocation2 + $0x20] sm:$0xff] }
  0x2c   :  { %298 = vmatpush.msra.mxu1 %v210_v23  ;;  %900 = vmatpush.msra.mxu3 %v210_v23  ;;  %v175_v4 = vld [vmem:[#allocation5 + $0xc8] sm:$0xff]  ;;  %v1124_v9 = vld [vmem:[#allocation2 + $0x60] sm:$0xff]  ;;  %v172_v12 = vld [vmem:[#allocation5 + $0xb0] sm:$0xff] }
  0x2d   :  { %258 = vmatpush.msra.mxu0 %v159_v24  ;;  %885 = vmatpush.msra.mxu2 %v159_v24  ;;  %v223_v5 = vld [vmem:[#allocation5 + $0x248] sm:$0xff]  ;;  %v220_v13 = vld [vmem:[#allocation5 + $0x230] sm:$0xff]  ;;  %v173_v14 = vld [vmem:[#allocation5 + $0xb8] sm:$0xff] }
  0x2e   :  { %299 = vmatpush.msra.mxu1 %v207_v25  ;;  %901 = vmatpush.msra.mxu3 %v207_v25  ;;  %v1126_v10 = vld [vmem:[#allocation2 + $0x28] sm:$0xff]  ;;  %v221_v15 = vld [vmem:[#allocation5 + $0x238] sm:$0xff]  ;;  %v170_v18 = vld [vmem:[#allocation5 + $0xa0] sm:$0xff] }
  0x2f   :  { %259 = vmatpush.msra.mxu0 %v156_v26  ;;  %886 = vmatpush.msra.mxu2 %v156_v26  ;;  %v1128_v11 = vld [vmem:[#allocation2 + $0x68] sm:$0xff]  ;;  %v169_v16 = vld [vmem:[#allocation5 + $0x98] sm:$0xff]  ;;  %v218_v19 = vld [vmem:[#allocation5 + $0x220] sm:$0xff] }
  0x30   :  { %300 = vmatpush.msra.mxu1 %v204_v27  ;;  %902 = vmatpush.msra.mxu3 %v204_v27  ;;  %v217_v17 = vld [vmem:[#allocation5 + $0x218] sm:$0xff]  ;;  %v166_v20 = vld [vmem:[#allocation5 + $0x80] sm:$0xff]  ;;  %v167_v22 = vld [vmem:[#allocation5 + $0x88] sm:$0xff] }
  0x31   :  { %260 = vmatpush.msra.mxu0 %v153_v28  ;;  %887 = vmatpush.msra.mxu2 %v153_v28  ;;  %v214_v21 = vld [vmem:[#allocation5 + $0x200] sm:$0xff]  ;;  %v215_v23 = vld [vmem:[#allocation5 + $0x208] sm:$0xff]  ;;  %v164_v26 = vld [vmem:[#allocation5 + $0x70] sm:$0xff] }
  0x32   :  { %301 = vmatpush.msra.mxu1 %v201_v29  ;;  %903 = vmatpush.msra.mxu3 %v201_v29  ;;  %v163_v24 = vld [vmem:[#allocation5 + $0x68] sm:$0xff]  ;;  %v212_v27 = vld [vmem:[#allocation5 + $0x1f0] sm:$0xff] }
  0x33   :  { %261 = vmatpush.msra.mxu0 %v150_v30  ;;  %888 = vmatpush.msra.mxu2 %v150_v30  ;;  %v211_v25 = vld [vmem:[#allocation5 + $0x1e8] sm:$0xff]  ;;  %v116_v28 = vld [vmem:[#allocation2 + $0x30] sm:$0xff]  ;;  %v117_v30 = vld [vmem:[#allocation2 + $0x38] sm:$0xff] }
  0x34   :  { %302 = vmatpush.msra.mxu1 %v198_v31  ;;  %904 = vmatpush.msra.mxu3 %v198_v31  ;;  %v1134_v29 = vld [vmem:[#allocation2 + $0x70] sm:$0xff]  ;;  %v1136_v31 = vld [vmem:[#allocation2 + $0x78] sm:$0xff] }
  0x35   :  { %262 = vmatmul.f32.vlgmr.msra.gmra.mxu0 %v1098_v32  ;;  %274 = vmatmul.f32.vlgmr.msra.gmra.mxu2 %v1100_v33 }
  0x36   :  { %303 = vmatmul.f32.vlgmr.msra.gmra.mxu1 %v1102_v34  ;;  %315 = vmatmul.f32.vlgmr.msra.gmra.mxu3 %v1104_v35 }
  0x37   :  { %328 = vmatpush.msrb.mxu2 %v196_v36  ;;  %369 = vmatpush.msrb.mxu3 %v244_v37  ;;  %v160_v36 = vld [vmem:[#allocation5 + $0x50] sm:$0xff] }
  0x38   :  { %410 = vmatpush.msrb.mxu0 %v197_v38  ;;  %451 = vmatpush.msrb.mxu1 %v245_v39  ;;  %v208_v37 = vld [vmem:[#allocation5 + $0x1d0] sm:$0xff]  ;;  %v161_v38 = vld [vmem:[#allocation5 + $0x58] sm:$0xff] }
  0x39   :  { %329 = vmatpush.msrb.mxu2 %v193_v40  ;;  %370 = vmatpush.msrb.mxu3 %v241_v41  ;;  %v209_v39 = vld [vmem:[#allocation5 + $0x1d8] sm:$0xff] }
  0x3a   :  { %411 = vmatpush.msrb.mxu0 %v194_v42  ;;  %452 = vmatpush.msrb.mxu1 %v242_v43  ;;  %v157_v40 = vld [vmem:[#allocation5 + $0x38] sm:$0xff]  ;;  %v158_v42 = vld [vmem:[#allocation5 + $0x40] sm:$0xff] }
  0x3b   :  { %330 = vmatpush.msrb.mxu2 %v190_v44  ;;  %371 = vmatpush.msrb.mxu3 %v238_v45  ;;  %v205_v41 = vld [vmem:[#allocation5 + $0x1b8] sm:$0xff]  ;;  %v206_v43 = vld [vmem:[#allocation5 + $0x1c0] sm:$0xff] }
  0x3c   :  { %412 = vmatpush.msrb.mxu0 %v191_v46  ;;  %453 = vmatpush.msrb.mxu1 %v239_v47  ;;  %v154_v44 = vld [vmem:[#allocation5 + $0x20] sm:$0xff]  ;;  %v155_v46 = vld [vmem:[#allocation5 + $0x28] sm:$0xff] }
  0x3d   :  { %331 = vmatpush.msrb.mxu2 %v187_v48  ;;  %372 = vmatpush.msrb.mxu3 %v235_v49  ;;  %v202_v45 = vld [vmem:[#allocation5 + $0x1a0] sm:$0xff]  ;;  %v203_v47 = vld [vmem:[#allocation5 + $0x1a8] sm:$0xff] }
  0x3e   :  { %413 = vmatpush.msrb.mxu0 %v188_v50  ;;  %454 = vmatpush.msrb.mxu1 %v236_v51  ;;  %v151_v48 = vld [vmem:[#allocation5 + $0x8] sm:$0xff]  ;;  %v152_v50 = vld [vmem:[#allocation5 + $0x10] sm:$0xff] }
  0x3f   :  { %265 = vmatmul.f32.gmra.mxu0 %v1110_v52  ;;  %277 = vmatmul.f32.gmra.mxu2 %v1112_v53  ;;  %v199_v49 = vld [vmem:[#allocation5 + $0x188] sm:$0xff]  ;;  %v200_v51 = vld [vmem:[#allocation5 + $0x190] sm:$0xff] }
  0x40   :  { %306 = vmatmul.f32.gmra.mxu1 %v1114_v54  ;;  %318 = vmatmul.f32.gmra.mxu3 %v1116_v55 }
  0x41   :  { %332 = vmatpush.msrb.mxu2 %v184_v56  ;;  %373 = vmatpush.msrb.mxu3 %v232_v57 }
  0x42   :  { %414 = vmatpush.msrb.mxu0 %v185_v58  ;;  %455 = vmatpush.msrb.mxu1 %v233_v59 }
  0x43   :  { %333 = vmatpush.msrb.mxu2 %v181_v60  ;;  %374 = vmatpush.msrb.mxu3 %v229_v61 }
  0x44   :  { %415 = vmatpush.msrb.mxu0 %v182_v62  ;;  %456 = vmatpush.msrb.mxu1 %v230_v63 }
  0x45   :  { %334 = vmatpush.msrb.mxu2 %v178_v0  ;;  %375 = vmatpush.msrb.mxu3 %v226_v1 }
  0x46   :  { %416 = vmatpush.msrb.mxu0 %v179_v2  ;;  %457 = vmatpush.msrb.mxu1 %v227_v3 }
  0x47   :  { %335 = vmatpush.msrb.mxu2 %v175_v4  ;;  %376 = vmatpush.msrb.mxu3 %v223_v5 }
  0x48   :  { %417 = vmatpush.msrb.mxu0 %v176_v6  ;;  %458 = vmatpush.msrb.mxu1 %v224_v7 }
  0x49   :  { %268 = vmatmul.f32.gmra.mxu0 %v1122_v8  ;;  %280 = vmatmul.f32.gmra.mxu2 %v1124_v9 }
  0x4a   :  { %309 = vmatmul.f32.gmra.mxu1 %v1126_v10  ;;  %321 = vmatmul.f32.gmra.mxu3 %v1128_v11 }
  0x4b   :  { %336 = vmatpush.msrb.mxu2 %v172_v12  ;;  %377 = vmatpush.msrb.mxu3 %v220_v13 }
  0x4c   :  { %418 = vmatpush.msrb.mxu0 %v173_v14  ;;  %459 = vmatpush.msrb.mxu1 %v221_v15 }
  0x4d   :  { %337 = vmatpush.msrb.mxu2 %v169_v16  ;;  %378 = vmatpush.msrb.mxu3 %v217_v17 }
  0x4e   :  { %419 = vmatpush.msrb.mxu0 %v170_v18  ;;  %460 = vmatpush.msrb.mxu1 %v218_v19 }
  0x4f   :  { %338 = vmatpush.msrb.mxu2 %v166_v20  ;;  %379 = vmatpush.msrb.mxu3 %v214_v21 }
  0x50   :  { %420 = vmatpush.msrb.mxu0 %v167_v22  ;;  %461 = vmatpush.msrb.mxu1 %v215_v23 }
  0x51   :  { %339 = vmatpush.msrb.mxu2 %v163_v24  ;;  %380 = vmatpush.msrb.mxu3 %v211_v25 }
  0x52   :  { %421 = vmatpush.msrb.mxu0 %v164_v26  ;;  %462 = vmatpush.msrb.mxu1 %v212_v27 }
  0x53   :  { %271 = vmatmul.f32.gmra.mxu0 %v116_v28  ;;  %283 = vmatmul.f32.gmra.mxu2 %v1134_v29 }
  0x54   :  { %312 = vmatmul.f32.gmra.mxu1 %v117_v30  ;;  %324 = vmatmul.f32.gmra.mxu3 %v1136_v31 }
  0x55   :  { %340 = vmatpush.msrb.mxu2 %v160_v36  ;;  %381 = vmatpush.msrb.mxu3 %v208_v37 }
  0x56   :  { %422 = vmatpush.msrb.mxu0 %v161_v38  ;;  %463 = vmatpush.msrb.mxu1 %v209_v39 }
  0x57   :  { %341 = vmatpush.msrb.mxu2 %v157_v40  ;;  %382 = vmatpush.msrb.mxu3 %v205_v41 }
  0x58   :  { %423 = vmatpush.msrb.mxu0 %v158_v42  ;;  %464 = vmatpush.msrb.mxu1 %v206_v43 }
  0x59   :  { %342 = vmatpush.msrb.mxu2 %v154_v44  ;;  %383 = vmatpush.msrb.mxu3 %v202_v45 }
  0x5a   :  { %424 = vmatpush.msrb.mxu0 %v155_v46  ;;  %465 = vmatpush.msrb.mxu1 %v203_v47 }
  0x5b   :  { %343 = vmatpush.msrb.mxu2 %v151_v48  ;;  %384 = vmatpush.msrb.mxu3 %v199_v49 }
  0x5c   :  { %425 = vmatpush.msrb.mxu0 %v152_v50  ;;  %466 = vmatpush.msrb.mxu1 %v200_v51 }
  0x5d   :  { %344 = vmatmul.f32.vlgmr.msrb.gmra.mxu2 %v1098_v32  ;;  %385 = vmatmul.f32.vlgmr.msrb.gmra.mxu3 %v1102_v34 }
  0x5e   :  { %426 = vmatmul.f32.vlgmr.msrb.gmra.mxu0 %v1098_v32  ;;  %467 = vmatmul.f32.vlgmr.msrb.gmra.mxu1 %v1102_v34 }
  0x65   :  { %347 = vmatmul.f32.gmra.mxu2 %v1110_v52  ;;  %388 = vmatmul.f32.gmra.mxu3 %v1114_v54 }
  0x66   :  { %429 = vmatmul.f32.gmra.mxu0 %v1110_v52  ;;  %470 = vmatmul.f32.gmra.mxu1 %v1114_v54 }
  0x6d   :  { %350 = vmatmul.f32.gmra.mxu2 %v1122_v8  ;;  %391 = vmatmul.f32.gmra.mxu3 %v1126_v10 }
  0x6e   :  { %432 = vmatmul.f32.gmra.mxu0 %v1122_v8  ;;  %473 = vmatmul.f32.gmra.mxu1 %v1126_v10 }
  0x75   :  { %353 = vmatmul.f32.gmra.mxu2 %v116_v28  ;;  %394 = vmatmul.f32.gmra.mxu3 %v117_v30 }
  0x76   :  { %435 = vmatmul.f32.gmra.mxu0 %v116_v28  ;;  %476 = vmatmul.f32.gmra.mxu1 %v117_v30 }
  0x7d   :  { %356 = vmatmul.f32.gmra.mxu2 %v1100_v33  ;;  %397 = vmatmul.f32.gmra.mxu3 %v1104_v35 }
  0x7e   :  { %438 = vmatmul.f32.gmra.mxu0 %v1100_v33  ;;  %479 = vmatmul.f32.gmra.mxu1 %v1104_v35 }
  0x85   :  { %359 = vmatmul.f32.gmra.mxu2 %v1112_v53  ;;  %400 = vmatmul.f32.gmra.mxu3 %v1116_v55 }
  0x86   :  { %441 = vmatmul.f32.gmra.mxu0 %v1112_v53  ;;  %482 = vmatmul.f32.gmra.mxu1 %v1116_v55 }
  0x8d   :  { %362 = vmatmul.f32.gmra.mxu2 %v1124_v9  ;;  %403 = vmatmul.f32.gmra.mxu3 %v1128_v11 }
  0x8e   :  { %444 = vmatmul.f32.gmra.mxu0 %v1124_v9  ;;  %485 = vmatmul.f32.gmra.mxu1 %v1128_v11 }
  0x95   :  { %365 = vmatmul.f32.gmra.mxu2 %v1134_v29  ;;  %406 = vmatmul.f32.gmra.mxu3 %v1136_v31 }
  0x96   :  { %447 = vmatmul.f32.gmra.mxu0 %v1134_v29  ;;  %488 = vmatmul.f32.gmra.mxu1 %v1136_v31 }
  0xb2   :  { %v263_v32 = vpop.f32.mrf.mxu0 }
  0xb3   :  { %v304_v33 = vpop.f32.mrf.mxu1 }
  0xb4   :  { %v305_v59 = vadd.f32 %v304_v33, %v263_v32 }
  0xb8   :  { %v275_v34 = vpop.f32.mrf.mxu2 }
  0xb9   :  { %v316_v35 = vpop.f32.mrf.mxu3 }
  0xba   :  { %v317_v1 = vadd.f32 %v316_v35, %v275_v34 }
  0xbc   :  { %v266_v52 = vpop.f32.mrf.mxu0 }
  0xbd   :  { %v307_v53 = vpop.f32.mrf.mxu1 }
  0xbe   :  { %v308_v58 = vadd.f32 %v307_v53, %v266_v52 }
  0xc0   :  { %v567_v3 = vadd.f32 %v308_v58, %v305_v59 }
  0xc2   :  { %v278_v54 = vpop.f32.mrf.mxu2 }
  0xc3   :  { %v319_v55 = vpop.f32.mrf.mxu3 }
  0xc4   :  { %v320_v4 = vadd.f32 %v319_v55, %v278_v54 }
  0xc6   :  { %v269_v56 = vpop.f32.mrf.mxu0 }
  0xc7   :  { %v310_v57 = vpop.f32.mrf.mxu1 }
  0xc8   :  { %v311_v60 = vadd.f32 %v310_v57, %v269_v56 }
  0xca   :  { %v568_v5 = vadd.f32 %v567_v3, %v311_v60 }
  0xcc   :  { %v281_v61 = vpop.f32.mrf.mxu2 }
  0xcd   :  { %v322_v62 = vpop.f32.mrf.mxu3 }
  0xce   :  { %v323_v6 = vadd.f32 %v322_v62, %v281_v61 }
  0xd0   :  { %v272_v63 = vpop.f32.mrf.mxu0 }
  0xd1   :  { %v313_v0 = vpop.f32.mrf.mxu1 }
  0xd2   :  { %v314_v2 = vadd.f32 %v313_v0, %v272_v63 }
  0xd4   :  { %v569_v8 = vadd.f32 %v568_v5, %v314_v2 }
  0xd6   :  { %v284_v7 = vpop.f32.mrf.mxu2  ;;  %v570_v11 = vadd.f32 %v569_v8, %v317_v1 }
  0xd7   :  { %v325_v9 = vpop.f32.mrf.mxu3 }
  0xd8   :  { %v326_v10 = vadd.f32 %v325_v9, %v284_v7  ;;  %v571_v12 = vadd.f32 %v570_v11, %v320_v4 }
  0xda   :  { %v572_v15 = vadd.f32 %v571_v12, %v323_v6 }
  0xdb   :  { %v427_v13 = vpop.f32.mrf.mxu0  ;;  %v468_v14 = vpop.f32.mrf.mxu1 }
  0xdc   :  { %v573_v16 = vadd.f32 %v572_v15, %v326_v10  ;;  %v1204_v8 = vadd.f32 %v468_v14, %v427_v13 }
  0xde   :  { %v574_v17 = vrot.slane %v573_v16, 4 }
  0xe0   :  { %v1168_v18 = vpop.f32.mrf.mxu2  ;;  %v386_v19 = vpop.f32.mrf.mxu3  ;;  %v575_v20 = vadd.f32 %v574_v17, %v573_v16 }
  0xe2   :  { %v576_v23 = vrot.slane %v575_v20, 2 }
  0xe3   :  { %v430_v21 = vpop.f32.mrf.mxu0  ;;  %v471_v22 = vpop.f32.mrf.mxu1 }
  0xe4   :  { %v577_v24 = vadd.f32 %v576_v23, %v575_v20  ;;  %v1215_v23 = vadd.f32 %v386_v19, %v1168_v18 }
  0xe6   :  { %v578_v25 = vrot.slane %v577_v24, 1 }
  0xe8   :  { %v348_v26 = vpop.f32.mrf.mxu2  ;;  %v389_v27 = vpop.f32.mrf.mxu3  ;;  %v579_v28 = vadd.f32 %v578_v25, %v577_v24 }
  0xe9   :  { %v1210_v16 = vadd.f32 %v389_v27, %v348_v26 }
  0xea   :  { %v606_v31 = vmul.f32 0.015625, %v579_v28 }
  0xeb   :  { %v433_v29 = vpop.f32.mrf.mxu0  ;;  %v474_v30 = vpop.f32.mrf.mxu1 }
  0xec   :  { %v1170_v36 = vsub.f32 %v305_v59, %v606_v31  ;;  %v1172_v37 = vsub.f32 %v308_v58, %v606_v31  ;;  %v1174_v38 = vsub.f32 %v311_v60, %v606_v31  ;;  %v1176_v39 = vsub.f32 %v314_v2, %v606_v31 }
  0xed   :  { %v1182_v44 = vsub.f32 %v317_v1, %v606_v31  ;;  %v1186_v49 = vsub.f32 %v320_v4, %v606_v31  ;;  %v1190_v32 = vsub.f32 %v323_v6, %v606_v31  ;;  %v1194_v35 = vsub.f32 %v326_v10, %v606_v31 }
  0xee   :  { %v633_v40 = vmul.f32 %v1170_v36, %v1170_v36  ;;  %v636_v41 = vmul.f32 %v1172_v37, %v1172_v37  ;;  %v639_v45 = vmul.f32 %v1174_v38, %v1174_v38  ;;  %v642_v50 = vmul.f32 %v1176_v39, %v1176_v39 }
  0xef   :  { %v645_v33 = vmul.f32 %v1182_v44, %v1182_v44  ;;  %v648_v52 = vmul.f32 %v1186_v49, %v1186_v49  ;;  %v651_v56 = vmul.f32 %v1190_v32, %v1190_v32  ;;  %v654_v60 = vmul.f32 %v1194_v35, %v1194_v35 }
  0xf0   :  { %v351_v42 = vpop.f32.mrf.mxu2  ;;  %v392_v43 = vpop.f32.mrf.mxu3  ;;  %v657_v46 = vadd.f32 %v636_v41, %v633_v40  ;;  %v1202_v6 = vadd.f32 %v471_v22, %v430_v21  ;;  %v1206_v9 = vadd.f32 %v474_v30, %v433_v29  ;;  %v580_v41 = vadd.f32 %v1210_v16, %v1215_v23 }
  0xf1   :  { %v1217_v21 = vadd.f32 %v392_v43, %v351_v42 }
  0xf2   :  { %v658_v51 = vadd.f32 %v657_v46, %v639_v45  ;;  %v593_v25 = vadd.f32 %v1202_v6, %v1204_v8 }
  0xf3   :  { %v436_v47 = vpop.f32.mrf.mxu0  ;;  %v477_v48 = vpop.f32.mrf.mxu1 }
  0xf4   :  { %v659_v34 = vadd.f32 %v658_v51, %v642_v50  ;;  %v1208_v11 = vadd.f32 %v477_v48, %v436_v47  ;;  %v594_v29 = vadd.f32 %v593_v25, %v1206_v9  ;;  %v581_v47 = vadd.f32 %v580_v41, %v1217_v21 }
  0xf6   :  { %v660_v53 = vadd.f32 %v659_v34, %v645_v33  ;;  %v595_v31 = vadd.f32 %v594_v29, %v1208_v11 }
  0xf8   :  { %v354_v54 = vpop.f32.mrf.mxu2  ;;  %v395_v55 = vpop.f32.mrf.mxu3  ;;  %v661_v57 = vadd.f32 %v660_v53, %v648_v52 }
  0xf9   :  { %v1223_v28 = vadd.f32 %v395_v55, %v354_v54 }
  0xfa   :  { %v662_v61 = vadd.f32 %v661_v57, %v651_v56 }
  0xfb   :  { %v439_v58 = vpop.f32.mrf.mxu0  ;;  %v480_v59 = vpop.f32.mrf.mxu1  ;;  %v582_v51 = vadd.f32 %v581_v47, %v1223_v28 }
  0xfc   :  { %v663_v62 = vadd.f32 %v662_v61, %v654_v60  ;;  %v1212_v20 = vadd.f32 %v480_v59, %v439_v58 }
  0xfe   :  { %v664_v63 = vrot.slane %v663_v62, 4  ;;  %v596_v42 = vadd.f32 %v595_v31, %v1212_v20 }
 0x100   :  { %v357_v0 = vpop.f32.mrf.mxu2  ;;  %v398_v1 = vpop.f32.mrf.mxu3  ;;  %v665_v2 = vadd.f32 %v664_v63, %v663_v62  ;;  %v1249_v62 = vld [vmem:[#allocation7] sm:$0x7] }
 0x101   :  { %v1228_v30 = vadd.f32 %v398_v1, %v357_v0 }
 0x102   :  { %v666_v5 = vrot.slane %v665_v2, 2 }
 0x103   :  { %v442_v3 = vpop.f32.mrf.mxu0  ;;  %v483_v4 = vpop.f32.mrf.mxu1  ;;  %v583_v53 = vadd.f32 %v582_v51, %v1228_v30 }
 0x104   :  { %v667_v7 = vadd.f32 %v666_v5, %v665_v2  ;;  %v1219_v24 = vadd.f32 %v483_v4, %v442_v3  ;;  %v734_v3 = vperm.slane %v1249_v62, 0 }
 0x106   :  { %v668_v10 = vrot.slane %v667_v7, 1  ;;  %v597_v50 = vadd.f32 %v596_v42, %v1219_v24 }
 0x108   :  { %v360_v12 = vpop.f32.mrf.mxu2  ;;  %v401_v15 = vpop.f32.mrf.mxu3  ;;  %v669_v17 = vadd.f32 %v668_v10, %v667_v7 }
 0x109   :  { %v1231_v40 = vadd.f32 %v401_v15, %v360_v12  ;;  %v1254_v15 = vld [vmem:[#allocation8] sm:$0x7] }
 0x10a   :  { %v696_v14 = vmul.f32 0.015625, %v669_v17  ;;  %v772_v25 = vperm.slane %v1254_v15, 0 }
 0x10b   :  { %v445_v22 = vpop.f32.mrf.mxu0  ;;  %v486_v13 = vpop.f32.mrf.mxu1  ;;  %v584_v59 = vadd.f32 %v583_v53, %v1231_v40 }
 0x10c   :  { %v699_v26 = vadd.f32 1e-05, %v696_v14  ;;  %v1225_v27 = vadd.f32 %v486_v13, %v445_v22 }
 0x10e   :  { %915 = vrsqrt.f32 %v699_v26  ;;  %v598_v34 = vadd.f32 %v597_v50, %v1225_v27  ;;  %vm708_vm1 = vweird.f32 %v699_v26 }
 0x110   :  { %v363_v18 = vpop.f32.mrf.mxu2  ;;  %v404_v19 = vpop.f32.mrf.mxu3 }
 0x111   :  { %v1236_v43 = vadd.f32 %v404_v19, %v363_v18 }
 0x113   :  { %v448_v45 = vpop.f32.mrf.mxu0  ;;  %v489_v46 = vpop.f32.mrf.mxu1  ;;  %v585_v63 = vadd.f32 %v584_v59, %v1236_v43 }
 0x114   :  { %v1239_v48 = vadd.f32 %v489_v46, %v448_v45  ;;  %v916_v33 = vpop.eup %915 }
 0x115   :  { %v703_v52 = vmul.f32 %v916_v33, %v699_v26  ;;  %vm709_vm0 = vweird.f32 %v916_v33 }
 0x116   :  { %v599_v54 = vadd.f32 %v598_v34, %v1239_v48  ;;  %vm710_vm2 = vmor %vm708_vm1, %vm709_vm0 }
 0x117   :  { %v704_v57 = vmul.f32 %v916_v33, %v703_v52 }
 0x118   :  { %v366_v55 = vpop.f32.mrf.mxu2  ;;  %v407_v56 = vpop.f32.mrf.mxu3  ;;  %v600_v60 = vrot.slane %v599_v54, 4 }
 0x119   :  { %v1246_v58 = vadd.f32 %v407_v56, %v366_v55  ;;  %v705_v61 = vmul.f32 0.5, %v704_v57 }
 0x11a   :  { %v601_v0 = vadd.f32 %v600_v60, %v599_v54 }
 0x11b   :  { %v706_v1 = vsub.f32 1.5, %v705_v61  ;;  %v586_v2 = vadd.f32 %v585_v63, %v1246_v58 }
 0x11c   :  { %v602_v4 = vrot.slane %v601_v0, 2 }
 0x11d   :  { %v707_v5 = vmul.f32 %v916_v33, %v706_v1  ;;  %v587_v7 = vrot.slane %v586_v2, 4 }
 0x11e   :  { %v603_v10 = vadd.f32 %v602_v4, %v601_v0 }
 0x11f   :  { %v711_v12 = vsel %vm710_vm2, %v916_v33, %v707_v5  ;;  %v588_v17 = vadd.f32 %v587_v7, %v586_v2 }
 0x120   :  { %v740_v22 = vmul.f32 %v734_v3, %v711_v12  ;;  %v604_v13 = vrot.slane %v603_v10, 1 }
 0x121   :  { %v589_v18 = vrot.slane %v588_v17, 2 }
 0x122   :  { %v743_v14 = vperm.slane %v740_v22, 0  ;;  %v605_v29 = vadd.f32 %v604_v13, %v603_v10 }
 0x123   :  { %v590_v55 = vadd.f32 %v589_v18, %v588_v17 }
 0x124   :  { %v746_v19 = vmul.f32 %v743_v14, %v1170_v36  ;;  %v749_v31 = vmul.f32 %v743_v14, %v1172_v37  ;;  %v752_v26 = vmul.f32 %v743_v14, %v1174_v38  ;;  %v755_v41 = vmul.f32 %v743_v14, %v1176_v39 }
 0x125   :  { %v758_v42 = vmul.f32 %v743_v14, %v1182_v44  ;;  %v761_v45 = vmul.f32 %v743_v14, %v1186_v49  ;;  %v764_v46 = vmul.f32 %v743_v14, %v1190_v32  ;;  %v767_v47 = vmul.f32 %v743_v14, %v1194_v35 }
 0x126   :  { %v778_v50 = vadd.f32 %v772_v25, %v746_v19  ;;  %v781_v51 = vadd.f32 %v772_v25, %v749_v31  ;;  %v784_v33 = vadd.f32 %v772_v25, %v752_v26  ;;  %v787_v34 = vadd.f32 %v772_v25, %v755_v41 }
 0x127   :  { %v790_v52 = vadd.f32 %v772_v25, %v758_v42  ;;  %v793_v36 = vadd.f32 %v772_v25, %v761_v45  ;;  %v796_v53 = vadd.f32 %v772_v25, %v764_v46  ;;  %v799_v39 = vadd.f32 %v772_v25, %v767_v47 }
 0x128   :  { %v802_v37 = vmax.f32 %v778_v50, 0.0  ;;  %v805_v54 = vmax.f32 %v781_v51, 0.0  ;;  %v808_v38 = vmax.f32 %v784_v33, 0.0  ;;  %v811_v56 = vmax.f32 %v787_v34, 0.0 }
 0x129   :  { %v814_v44 = vmax.f32 %v790_v52, 0.0  ;;  %v608_v49 = vmul.f32 0.015625, %v605_v29  ;;  %v817_v57 = vmax.f32 %v793_v36, 0.0  ;;  %v820_v32 = vmax.f32 %v796_v53, 0.0 }
 0x12a   :  { %826 = vst [vmem:[#allocation10] sm:$0xff] %v802_v37  ;;  %v591_v61 = vrot.slane %v590_v55, 1  ;;  %v823_v63 = vmax.f32 %v799_v39, 0.0 }
 0x12b   :  { %829 = vst [vmem:[#allocation10 + $0x18] sm:$0xff] %v805_v54  ;;  %v1266_v35 = vsub.f32 %v1204_v8, %v608_v49  ;;  %v1269_v59 = vsub.f32 %v1202_v6, %v608_v49  ;;  %v1272_v60 = vsub.f32 %v1206_v9, %v608_v49  ;;  %v1275_v0 = vsub.f32 %v1208_v11, %v608_v49 }
 0x12c   :  { %832 = vst [vmem:[#allocation10 + $0x30] sm:$0xff] %v808_v38  ;;  %v1282_v6 = vsub.f32 %v1212_v20, %v608_v49  ;;  %v592_v3 = vadd.f32 %v591_v61, %v590_v55  ;;  %v1287_v11 = vsub.f32 %v1219_v24, %v608_v49  ;;  %v1292_v10 = vsub.f32 %v1225_v27, %v608_v49 }
 0x12d   :  { %835 = vst [vmem:[#allocation10 + $0x48] sm:$0xff] %v811_v56  ;;  %v635_v1 = vmul.f32 %v1266_v35, %v1266_v35  ;;  %v638_v8 = vmul.f32 %v1269_v59, %v1269_v59  ;;  %v641_v9 = vmul.f32 %v1272_v60, %v1272_v60  ;;  %v644_v4 = vmul.f32 %v1275_v0, %v1275_v0 }
 0x12e   :  { %838 = vst [vmem:[#allocation10 + $0x60] sm:$0xff] %v814_v44  ;;  %v607_v7 = vmul.f32 0.015625, %v592_v3  ;;  %v647_v20 = vmul.f32 %v1282_v6, %v1282_v6  ;;  %v1306_v13 = vsub.f32 %v1239_v48, %v608_v49  ;;  %v650_v27 = vmul.f32 %v1287_v11, %v1287_v11 }
 0x12f   :  { %841 = vst [vmem:[#allocation10 + $0x78] sm:$0xff] %v817_v57  ;;  %v683_v2 = vadd.f32 %v638_v8, %v635_v1 }
 0x130   :  { %844 = vst [vmem:[#allocation10 + $0x90] sm:$0xff] %v820_v32  ;;  %v1297_v17 = vsub.f32 %v1215_v23, %v607_v7  ;;  %v1300_v22 = vsub.f32 %v1210_v16, %v607_v7  ;;  %v1303_v24 = vsub.f32 %v1217_v21, %v607_v7  ;;  %v1311_v25 = vsub.f32 %v1223_v28, %v607_v7 }
 0x131   :  { %847 = vst [vmem:[#allocation10 + $0xa8] sm:$0xff] %v823_v63  ;;  %v684_v5 = vadd.f32 %v683_v2, %v641_v9  ;;  %v653_v21 = vmul.f32 %v1292_v10, %v1292_v10  ;;  %v1320_v48 = vsub.f32 %v1228_v30, %v607_v7  ;;  %v656_v28 = vmul.f32 %v1306_v13, %v1306_v13 }
 0x132   :  { %v634_v23 = vmul.f32 %v1297_v17, %v1297_v17  ;;  %v637_v16 = vmul.f32 %v1300_v22, %v1300_v22  ;;  %v640_v18 = vmul.f32 %v1303_v24, %v1303_v24  ;;  %v1327_v26 = vsub.f32 %v1231_v40, %v607_v7 }
 0x133   :  { %v685_v12 = vadd.f32 %v684_v5, %v644_v4  ;;  %v643_v41 = vmul.f32 %v1311_v25, %v1311_v25  ;;  %v1332_v46 = vsub.f32 %v1236_v43, %v607_v7  ;;  %v646_v30 = vmul.f32 %v1320_v48, %v1320_v48 }
 0x134   :  { %v670_v19 = vadd.f32 %v637_v16, %v634_v23  ;;  %v1337_v51 = vsub.f32 %v1246_v58, %v607_v7  ;;  %v649_v40 = vmul.f32 %v1327_v26, %v1327_v26 }
 0x135   :  { %v686_v14 = vadd.f32 %v685_v12, %v647_v20  ;;  %v652_v52 = vmul.f32 %v1332_v46, %v1332_v46  ;;  %v736_v20 = vperm.slane %v1249_v62, 2 }
 0x136   :  { %v671_v42 = vadd.f32 %v670_v19, %v640_v18  ;;  %v655_v43 = vmul.f32 %v1337_v51, %v1337_v51  ;;  %v774_v18 = vperm.slane %v1254_v15, 2 }
 0x137   :  { %v687_v29 = vadd.f32 %v686_v14, %v650_v27 }
 0x138   :  { %v672_v47 = vadd.f32 %v671_v42, %v643_v41 }
 0x139   :  { %v688_v31 = vadd.f32 %v687_v29, %v653_v21 }
 0x13a   :  { %v673_v33 = vadd.f32 %v672_v47, %v646_v30 }
 0x13b   :  { %v689_v45 = vadd.f32 %v688_v31, %v656_v28 }
 0x13c   :  { %v674_v36 = vadd.f32 %v673_v33, %v649_v40 }
 0x13d   :  { %v690_v50 = vrot.slane %v689_v45, 4 }
 0x13e   :  { %v675_v37 = vadd.f32 %v674_v36, %v652_v52 }
 0x13f   :  { %v691_v34 = vadd.f32 %v690_v50, %v689_v45 }
 0x140   :  { %v676_v38 = vadd.f32 %v675_v37, %v655_v43 }
 0x141   :  { %v692_v53 = vrot.slane %v691_v34, 2 }
 0x142   :  { %v677_v39 = vrot.slane %v676_v38, 4 }
 0x143   :  { %v693_v54 = vadd.f32 %v692_v53, %v691_v34 }
 0x144   :  { %v678_v56 = vadd.f32 %v677_v39, %v676_v38 }
 0x145   :  { %v694_v55 = vrot.slane %v693_v54, 1 }
 0x146   :  { %v679_v49 = vrot.slane %v678_v56, 2 }
 0x147   :  { %v695_v58 = vadd.f32 %v694_v55, %v693_v54 }
 0x148   :  { %v680_v32 = vadd.f32 %v679_v49, %v678_v56  ;;  %v773_v56 = vperm.slane %v1254_v15, 1 }
 0x149   :  { %v698_v44 = vmul.f32 0.015625, %v695_v58 }
 0x14a   :  { %v681_v61 = vrot.slane %v680_v32, 1 }
 0x14b   :  { %v701_v57 = vadd.f32 1e-05, %v698_v44 }
 0x14c   :  { %v682_v63 = vadd.f32 %v681_v61, %v680_v32 }
 0x14d   :  { %917 = vrsqrt.f32 %v701_v57  ;;  %vm728_vm4 = vweird.f32 %v701_v57 }
 0x14e   :  { %v697_v1 = vmul.f32 0.015625, %v682_v63 }
 0x150   :  { %v700_v9 = vadd.f32 1e-05, %v697_v1 }
 0x152   :  { %919 = vrsqrt.f32 %v700_v9  ;;  %vm718_vm7 = vweird.f32 %v700_v9 }
 0x153   :  { %v918_v8 = vpop.eup %917 }
 0x154   :  { %v723_v2 = vmul.f32 %v918_v8, %v701_v57  ;;  %vm729_vm3 = vweird.f32 %v918_v8 }
 0x155   :  { %vm730_vm5 = vmor %vm728_vm4, %vm729_vm3 }
 0x156   :  { %v724_v3 = vmul.f32 %v918_v8, %v723_v2 }
 0x158   :  { %v725_v4 = vmul.f32 0.5, %v724_v3  ;;  %v920_v7 = vpop.eup %919 }
 0x159   :  { %v713_v27 = vmul.f32 %v920_v7, %v700_v9  ;;  %vm719_vm6 = vweird.f32 %v920_v7 }
 0x15a   :  { %v726_v5 = vsub.f32 1.5, %v725_v4  ;;  %vm720_vm8 = vmor %vm718_vm7, %vm719_vm6 }
 0x15b   :  { %v714_v23 = vmul.f32 %v920_v7, %v713_v27 }
 0x15c   :  { %v727_v12 = vmul.f32 %v918_v8, %v726_v5 }
 0x15d   :  { %v715_v21 = vmul.f32 0.5, %v714_v23 }
 0x15e   :  { %v731_v14 = vsel %vm730_vm5, %v918_v8, %v727_v12 }
 0x15f   :  { %v742_v16 = vmul.f32 %v736_v20, %v731_v14  ;;  %v716_v19 = vsub.f32 1.5, %v715_v21 }
 0x161   :  { %v745_v29 = vperm.slane %v742_v16, 0 }
 0x163   :  { %v748_v28 = vmul.f32 %v745_v29, %v1266_v35  ;;  %v751_v31 = vmul.f32 %v745_v29, %v1269_v59  ;;  %v754_v41 = vmul.f32 %v745_v29, %v1272_v60  ;;  %v757_v42 = vmul.f32 %v745_v29, %v1275_v0 }
 0x164   :  { %v760_v45 = vmul.f32 %v745_v29, %v1282_v6  ;;  %v763_v30 = vmul.f32 %v745_v29, %v1287_v11  ;;  %v766_v47 = vmul.f32 %v745_v29, %v1292_v10  ;;  %v769_v50 = vmul.f32 %v745_v29, %v1306_v13 }
 0x165   :  { %v780_v40 = vadd.f32 %v774_v18, %v748_v28  ;;  %v783_v33 = vadd.f32 %v774_v18, %v751_v31  ;;  %v786_v34 = vadd.f32 %v774_v18, %v754_v41  ;;  %v789_v52 = vadd.f32 %v774_v18, %v757_v42 }
 0x166   :  { %v792_v36 = vadd.f32 %v774_v18, %v760_v45  ;;  %v795_v35 = vadd.f32 %v774_v18, %v763_v30  ;;  %v798_v59 = vadd.f32 %v774_v18, %v766_v47  ;;  %v801_v0 = vadd.f32 %v774_v18, %v769_v50 }
 0x167   :  { %v804_v53 = vmax.f32 %v780_v40, 0.0  ;;  %v807_v60 = vmax.f32 %v783_v33, 0.0  ;;  %v810_v43 = vmax.f32 %v786_v34, 0.0  ;;  %v813_v37 = vmax.f32 %v789_v52, 0.0 }
 0x168   :  { %v735_v6 = vperm.slane %v1249_v62, 1  ;;  %v816_v11 = vmax.f32 %v792_v36, 0.0  ;;  %v717_v10 = vmul.f32 %v920_v7, %v716_v19  ;;  %v819_v13 = vmax.f32 %v795_v35, 0.0 }
 0x169   :  { %828 = vst [vmem:[#allocation10 + $0x10] sm:$0xff] %v804_v53  ;;  %v822_v54 = vmax.f32 %v798_v59, 0.0  ;;  %v825_v55 = vmax.f32 %v801_v0, 0.0 }
 0x16a   :  { %831 = vst [vmem:[#allocation10 + $0x28] sm:$0xff] %v807_v60  ;;  %v721_v38 = vsel %vm720_vm8, %v920_v7, %v717_v10 }
 0x16b   :  { %834 = vst [vmem:[#allocation10 + $0x40] sm:$0xff] %v810_v43  ;;  %v741_v39 = vmul.f32 %v735_v6, %v721_v38 }
 0x16c   :  { %837 = vst [vmem:[#allocation10 + $0x58] sm:$0xff] %v813_v37 }
 0x16d   :  { %840 = vst [vmem:[#allocation10 + $0x70] sm:$0xff] %v816_v11  ;;  %v744_v58 = vperm.slane %v741_v39, 0 }
 0x16e   :  { %843 = vst [vmem:[#allocation10 + $0x88] sm:$0xff] %v819_v13 }
 0x16f   :  { %846 = vst [vmem:[#allocation10 + $0xa0] sm:$0xff] %v822_v54  ;;  %v747_v62 = vmul.f32 %v744_v58, %v1297_v17  ;;  %v750_v44 = vmul.f32 %v744_v58, %v1300_v22  ;;  %v753_v49 = vmul.f32 %v744_v58, %v1303_v24  ;;  %v756_v57 = vmul.f32 %v744_v58, %v1311_v25 }
 0x170   :  { %849 = vst [vmem:[#allocation10 + $0xb8] sm:$0xff] %v825_v55  ;;  %v759_v32 = vmul.f32 %v744_v58, %v1320_v48  ;;  %v762_v61 = vmul.f32 %v744_v58, %v1327_v26  ;;  %v765_v63 = vmul.f32 %v744_v58, %v1332_v46  ;;  %v768_v1 = vmul.f32 %v744_v58, %v1337_v51 }
 0x171   :  { %v779_v8 = vadd.f32 %v773_v56, %v747_v62  ;;  %v782_v15 = vadd.f32 %v773_v56, %v750_v44  ;;  %v785_v9 = vadd.f32 %v773_v56, %v753_v49  ;;  %v788_v2 = vadd.f32 %v773_v56, %v756_v57 }
 0x172   :  { %v791_v3 = vadd.f32 %v773_v56, %v759_v32  ;;  %v794_v17 = vadd.f32 %v773_v56, %v762_v61  ;;  %v797_v4 = vadd.f32 %v773_v56, %v765_v63  ;;  %v800_v7 = vadd.f32 %v773_v56, %v768_v1 }
 0x173   :  { %v803_v22 = vmax.f32 %v779_v8, 0.0  ;;  %v806_v5 = vmax.f32 %v782_v15, 0.0  ;;  %v809_v24 = vmax.f32 %v785_v9, 0.0  ;;  %v812_v25 = vmax.f32 %v788_v2, 0.0 }
 0x174   :  { %v815_v20 = vmax.f32 %v791_v3, 0.0  ;;  %v818_v48 = vmax.f32 %v794_v17, 0.0  ;;  %v821_v26 = vmax.f32 %v797_v4, 0.0  ;;  %v824_v46 = vmax.f32 %v800_v7, 0.0 }
 0x175   :  { %827 = vst [vmem:[#allocation10 + $0x8] sm:$0xff] %v803_v22 }
 0x176   :  { %830 = vst [vmem:[#allocation10 + $0x20] sm:$0xff] %v806_v5 }
 0x177   :  { %833 = vst [vmem:[#allocation10 + $0x38] sm:$0xff] %v809_v24 }
 0x178   :  { %836 = vst [vmem:[#allocation10 + $0x50] sm:$0xff] %v812_v25 }
 0x179   :  { %839 = vst [vmem:[#allocation10 + $0x68] sm:$0xff] %v815_v20 }
 0x17a   :  { %842 = vst [vmem:[#allocation10 + $0x80] sm:$0xff] %v818_v48 }
 0x17b   :  { %845 = vst [vmem:[#allocation10 + $0x98] sm:$0xff] %v821_v26 }
 0x17c   :  { %848 = vst [vmem:[#allocation10 + $0xb0] sm:$0xff] %v824_v46 }
 0x17d   :  { %862 = dma.vmem_to_hbm [thread:$0]  %s855_s3, 3072, %s857_s13, [#allocation4], %s1050_s23, %s1050_s23, %s1051_s24  }
 0x17e   :  { %1047 = dma.done.wait [#allocation4], 3072  }
 0x17f   :  { %1048 = vsyncadd [#allocation4], 4294964224 }
 0x180   :  { %867 = vsyncpa [#allocation3], 1 }
 0x181   :  { %868 = vsyncpa [#allocation6], 1 }
 0x182   :  { %869 = vsyncpa [#allocation9], 1 }
 0x183   :  { %870 = vsyncpa [#allocation4], 1 }

</bundles_post_ra>
